<compile_context>
chip_gen: v7x
topology: tpu7x:2x2x1
jax: 0.10.0
libtpu: 0.0.40
codegen_flags: <defaults>
</compile_context>

<pallas_src>
import math

import jax
import jax.numpy as jnp
from jax.experimental import pallas as pl
from jax.experimental.pallas import tpu as pltpu


# ----------------------------------------------------------------------------
# Pallas kernel: full GenerateNode forward (embedding gather included)
# ----------------------------------------------------------------------------
def _generate_node_kernel(xcat_ref, label_idx_ref, mask_ref, emb_ref,
                          w_ref, b_ref, out_ref, label_out_ref):
    Bb = out_ref.shape[0]
    H2 = out_ref.shape[1]          # 2H
    H4 = 2 * H2                    # 4H
    E = emb_ref.shape[1]
    n_ops = emb_ref.shape[0]

    # --- nn.Embedding lookup, fused as a one-hot matmul (MXU, no dyn gather) ---
    onehot = (label_idx_ref[...] ==
              jax.lax.broadcasted_iota(jnp.int32, (Bb, n_ops), 1)
              ).astype(jnp.float32)                                   # (B, n_ops)
    label = jnp.dot(onehot, emb_ref[...],
                    preferred_element_type=jnp.float32)               # (B, E)
    label_out_ref[...] = label

    # --- all six Linear heads: two MXU dots against sublane-aligned row blocks
    #     of the fused weight; columns ordered [l | r | lr | rr | lg | rg] ------
    g = jnp.dot(xcat_ref[...], w_ref[0:H4, :],
                preferred_element_type=jnp.float32)                   # xcat rows
    g = g + jnp.dot(label, w_ref[H4:H4 + E, :],
                    preferred_element_type=jnp.float32)               # label rows
    g = g + b_ref[...]                                                # (B, 6H)

    t = jnp.tanh(g[:, :H4])          # [tanh_l | tanh_r | tanh_lr | tanh_rr]
    s = jax.nn.sigmoid(g[:, H4:])    # [sig_lg | sig_rg]

    # l_child = (tanh_l + tanh_lr*left_mask) * sig_lg
    # r_child = (tanh_r + tanh_rr*right_mask) * sig_rg
    # computed on 64-lane halves in one FMA + one mul; output written lane-dense.
    out_ref[...] = (t[:, :H2] + t[:, H2:H4] * mask_ref[...]) * s


# ----------------------------------------------------------------------------
# Host-side weight fusion (done once; mirrors the PyTorch Linear layouts)
# Fused input row order: [node_emb | ctx | left_emb | right_emb | node_label]
# Fused output column order: [l | r | lr | rr | lg | rg]
# ----------------------------------------------------------------------------
def build_fused_weights(raw, hidden_size, embedding_size):
    H, E = hidden_size, embedding_size
    din = 4 * H + E
    r_node, r_ctx, r_left, r_right, r_lab = 0, H, 2 * H, 3 * H, 4 * H

    W = jnp.zeros((din, 6 * H), jnp.float32)

    # Heads whose PyTorch input is cat(node_emb, current_context, node_label):
    #   col 0 -> generate_l, 1 -> generate_r, 4 -> generate_lg, 5 -> generate_rg
    for col, name in ((0, "generate_l"), (1, "generate_r"),
                      (4, "generate_lg"), (5, "generate_rg")):
        w = raw[name]["w"].T                        # (2H+E, H), y = x @ w + b
        c0, c1 = col * H, (col + 1) * H
        W = W.at[r_node:r_node + H, c0:c1].set(w[0:H])
        W = W.at[r_ctx:r_ctx + H, c0:c1].set(w[H:2 * H])
        W = W.at[r_lab:r_lab + E, c0:c1].set(w[2 * H:2 * H + E])

    # generate_lr: input cat(left, node, ctx)  -> col 2
    # generate_rr: input cat(right, node, ctx) -> col 3
    for col, name, r_side in ((2, "generate_lr", r_left),
                              (3, "generate_rr", r_right)):
        w = raw[name]["w"].T                        # (3H, H)
        c0, c1 = col * H, (col + 1) * H
        W = W.at[r_side:r_side + H, c0:c1].set(w[0:H])
        W = W.at[r_node:r_node + H, c0:c1].set(w[H:2 * H])
        W = W.at[r_ctx:r_ctx + H, c0:c1].set(w[2 * H:3 * H])

    b = jnp.concatenate([raw[n]["b"] for n in
                         ("generate_l", "generate_r", "generate_lr",
                          "generate_rr", "generate_lg", "generate_rg")])
    # NOTE: for production, W could be stored in bfloat16 (halves the dominant
    # per-call DMA) with f32 accumulation; kept f32 here for tight verification.
    return W, b.reshape(1, 6 * H)


def _pick_block_rows(B):
    """Row-block size: whole batch when small, 128+ blocks (>=2 of them if
    possible) when batched so the parallel grid axis can shard across cores."""
    if B <= 128:
        return B
    for bm in (512, 256, 128):
        if B % bm == 0 and B // bm >= 2:
            return bm
    for bm in (512, 256, 128):
        if B % bm == 0:
            return bm
    return B


# ----------------------------------------------------------------------------
# Wrapper mirroring GenerateNode.forward
# ----------------------------------------------------------------------------
def generate_node_forward(emb_table, fused_w, fused_b, hidden_size,
                          node_embedding, node_label, current_context,
                          left_emb, right_emb, left_mask, right_mask):
    H = hidden_size
    B = node_embedding.shape[0]
    n_ops, E = emb_table.shape

    # TODO(synk): em_dropout (p=0.5) skipped — eval-mode (identity) semantics.

    # Wrapper-side layout plumbing (cheap, fuses into one XLA op each):
    node_emb = node_embedding.reshape(B, H)        # squeeze(1)
    ctx = current_context.reshape(B, H)            # squeeze(1)
    xcat = jnp.concatenate([node_emb, ctx, left_emb, right_emb], axis=1)  # (B,4H)
    lm = jnp.broadcast_to(left_mask.reshape(B, 1).astype(jnp.float32), (B, H))
    rm = jnp.broadcast_to(right_mask.reshape(B, 1).astype(jnp.float32), (B, H))
    mask2 = jnp.concatenate([lm, rm], axis=1)                              # (B,2H)
    label_idx = node_label.reshape(B, 1).astype(jnp.int32)                 # (B,1)

    BM = _pick_block_rows(B)
    grid = (B // BM,)

    def rows(cols):
        return pl.BlockSpec((BM, cols), lambda i: (i, 0))

    def whole(r, c):
        return pl.BlockSpec((r, c), lambda i: (0, 0))

    # NOTE: if this runs once per decode step, keeping fused_w resident across
    # calls (cross-call prefetch) removes the only nontrivial HBM traffic.
    out, node_label_ = pl.pallas_call(
        _generate_node_kernel,
        out_shape=(jax.ShapeDtypeStruct((B, 2 * H), jnp.float32),
                   jax.ShapeDtypeStruct((B, E), jnp.float32)),
        grid=grid,
        in_specs=[rows(4 * H),                    # xcat
                  rows(1),                        # label indices
                  rows(2 * H),                    # fused mask
                  whole(n_ops, E),                # embedding table
                  whole(4 * H + E, 6 * H),        # fused weight
                  whole(1, 6 * H)],               # fused bias
        out_specs=(rows(2 * H), rows(E)),
        compiler_params=pltpu.CompilerParams(
            dimension_semantics=("parallel",)),
    )(xcat, label_idx, mask2, emb_table, fused_w, fused_b)

    return out[:, :H], out[:, H:], node_label_


# ----------------------------------------------------------------------------
# Pure-JAX reference (direct transcription of the PyTorch forward, true-f32)
# ----------------------------------------------------------------------------
def ref_forward(raw, node_embedding, node_label, current_context,
                left_emb, right_emb, left_mask, right_mask):
    hp = jax.lax.Precision.HIGHEST
    node_label_ = raw["embeddings"][node_label]
    node_emb = node_embedding.squeeze(1)
    ctx = current_context.squeeze(1)

    def lin(name, x):
        return jnp.dot(x, raw[name]["w"].T, precision=hp) + raw[name]["b"]

    cat1 = jnp.concatenate([node_emb, ctx, node_label_], axis=1)
    cat_l = jnp.concatenate([left_emb, node_emb, ctx], axis=1)
    cat_r = jnp.concatenate([right_emb, node_emb, ctx], axis=1)

    lr_child = jnp.tanh(lin("generate_lr", cat_l)) * left_mask
    rr_child = jnp.tanh(lin("generate_rr", cat_r)) * right_mask
    l_child = jnp.tanh(lin("generate_l", cat1))
    l_child_g = jax.nn.sigmoid(lin("generate_lg", cat1))
    r_child = jnp.tanh(lin("generate_r", cat1))
    r_child_g = jax.nn.sigmoid(lin("generate_rg", cat1))
    l_child = (l_child + lr_child) * l_child_g
    r_child = (r_child + rr_child) * r_child_g
    return l_child, r_child, node_label_


# ----------------------------------------------------------------------------
# Deterministic parameter init (same shapes as the PyTorch module)
# ----------------------------------------------------------------------------
def init_raw_params(key, hidden_size, op_nums, embedding_size):
    raw = {}
    key, k_emb = jax.random.split(key)
    raw["embeddings"] = jax.random.normal(
        k_emb, (op_nums, embedding_size), jnp.float32)

    def linear(k, din, dout):
        kw, kb = jax.random.split(k)
        bound = 1.0 / math.sqrt(din)
        return {"w": jax.random.uniform(kw, (dout, din), jnp.float32, -bound, bound),
                "b": jax.random.uniform(kb, (dout,), jnp.float32, -bound, bound)}

    din1 = 2 * hidden_size + embedding_size
    din2 = 3 * hidden_size
    for name, din in (("generate_l", din1), ("generate_r", din1),
                      ("generate_lg", din1), ("generate_rg", din1),
                      ("generate_lr", din2), ("generate_rr", din2)):
        key, k = jax.random.split(key)
        raw[name] = linear(k, din, hidden_size)
    # generate_lrg / generate_rrg exist in the module but are unused in forward.
    return raw


if __name__ == "__main__":
    HIDDEN_SIZE = 32
    EMBEDDING_SIZE = 32
    OP_NUMS = 8

    key = jax.random.PRNGKey(0)
    key, kp = jax.random.split(key)
    raw = init_raw_params(kp, HIDDEN_SIZE, OP_NUMS, EMBEDDING_SIZE)
    fused_w, fused_b = build_fused_weights(raw, HIDDEN_SIZE, EMBEDDING_SIZE)

    def make_inputs(k, B):
        k1, k2, k3, k4, k5, k6, k7 = jax.random.split(k, 7)
        node_embedding = jax.random.normal(k1, (B, 1, HIDDEN_SIZE), jnp.float32)
        current_context = jax.random.normal(k2, (B, 1, HIDDEN_SIZE), jnp.float32)
        left_emb = jax.random.normal(k3, (B, HIDDEN_SIZE), jnp.float32)
        right_emb = jax.random.normal(k4, (B, HIDDEN_SIZE), jnp.float32)
        node_label = jax.random.randint(k5, (B,), 0, OP_NUMS, jnp.int32)
        left_mask = (jax.random.uniform(k6, (B, 1)) > 0.3).astype(jnp.float32)
        right_mask = (jax.random.uniform(k7, (B, 1)) > 0.3).astype(jnp.float32)
        return (node_embedding, node_label, current_context,
                left_emb, right_emb, left_mask, right_mask)

    # B=4: the module's native tiny shape.  B=256: batched path exercising the
    # row-block grid (two 128-row blocks, "parallel" -> megacore-shardable).
    for B in (4, 256):
        key, kin = jax.random.split(key)
        inputs = make_inputs(kin, B)

        l_child, r_child, node_label_ = generate_node_forward(
            raw["embeddings"], fused_w, fused_b, HIDDEN_SIZE, *inputs)
        l_child = jax.block_until_ready(l_child)
        r_child = jax.block_until_ready(r_child)
        node_label_ = jax.block_until_ready(node_label_)

        ref_l, ref_r, ref_lab = ref_forward(raw, *inputs)

        assert l_child.shape == (B, HIDDEN_SIZE)
        assert r_child.shape == (B, HIDDEN_SIZE)
        assert node_label_.shape == (B, EMBEDDING_SIZE)
        assert jnp.allclose(node_label_, ref_lab, atol=1e-5, rtol=1e-5)
        assert jnp.allclose(l_child, ref_l, atol=1e-5, rtol=1e-5)
        assert jnp.allclose(r_child, ref_r, atol=1e-5, rtol=1e-5)

    print("KERNEL_OK")
</pallas_src>

<mosaic_0001>
module attributes {stable_mosaic.version = 11 : i64} {
  func.func @_generate_node_kernel(%arg0: i32, %arg1: memref<4x128xf32, #tpu.memory_space<vmem>>, %arg2: memref<4x1xi32, #tpu.memory_space<vmem>>, %arg3: memref<4x64xf32, #tpu.memory_space<vmem>>, %arg4: memref<8x32xf32, #tpu.memory_space<vmem>>, %arg5: memref<160x192xf32, #tpu.memory_space<vmem>>, %arg6: memref<1x192xf32, #tpu.memory_space<vmem>>, %arg7: memref<4x64xf32, #tpu.memory_space<vmem>>, %arg8: memref<4x32xf32, #tpu.memory_space<vmem>>) attributes {dimension_semantics = [#tpu.dimension_semantics<parallel>], iteration_bounds = array<i64: 1>, scalar_prefetch = 0 : i64, scratch_operands = 0 : i64, tpu.core_type = #tpu.core_type<tc>, window_params = [{transform_indices = @transform_0, window_bounds = array<i64: 4, 128>}, {transform_indices = @transform_1, window_bounds = array<i64: 4, 1>}, {transform_indices = @transform_2, window_bounds = array<i64: 4, 64>}, {pipeline_mode = #tpu.pipeline_mode<synchronous>, transform_indices = @transform_3, window_bounds = array<i64: 8, 32>}, {pipeline_mode = #tpu.pipeline_mode<synchronous>, transform_indices = @transform_4, window_bounds = array<i64: 160, 192>}, {pipeline_mode = #tpu.pipeline_mode<synchronous>, transform_indices = @transform_5, window_bounds = array<i64: 1, 192>}, {transform_indices = @transform_6, window_bounds = array<i64: 4, 64>}, {transform_indices = @transform_7, window_bounds = array<i64: 4, 32>}]} {
    %c0 = arith.constant 0 : index
    %c0_0 = arith.constant 0 : index
    %0 = vector.load %arg2[%c0, %c0_0] : memref<4x1xi32, #tpu.memory_space<vmem>>, vector<4x1xi32>
    %1 = tpu.iota {dimensions = array<i32: 1>} : vector<4x8xi32>
    %2 = vector.broadcast %0 : vector<4x1xi32> to vector<4x8xi32>
    %3 = arith.cmpi eq, %2, %1 : vector<4x8xi32>
    %4 = arith.extui %3 : vector<4x8xi1> to vector<4x8xi32>
    %5 = arith.sitofp %4 : vector<4x8xi32> to vector<4x8xf32>
    %c0_1 = arith.constant 0 : index
    %c0_2 = arith.constant 0 : index
    %6 = vector.load %arg4[%c0_1, %c0_2] : memref<8x32xf32, #tpu.memory_space<vmem>>, vector<8x32xf32>
    %cst = arith.constant dense<0.000000e+00> : vector<4x32xf32>
    %7 = tpu.matmul %5, %6, %cst {dimension_numbers = #tpu.dot_dimension_numbers<[1], [0], [0], [1], [0, 0, 1, 1], [], []>} : vector<4x8xf32>, vector<8x32xf32>, vector<4x32xf32> -> vector<4x32xf32>
    %c0_3 = arith.constant 0 : index
    %c0_4 = arith.constant 0 : index
    %8 = vector.load %arg8[%c0_3, %c0_4] : memref<4x32xf32, #tpu.memory_space<vmem>>, vector<4x32xf32>
    tpu.vector_store %arg8[%c0_3, %c0_4], %7 {strides = array<i32>} : memref<4x32xf32, #tpu.memory_space<vmem>>, vector<4x32xf32>,
    %c0_5 = arith.constant 0 : index
    %c0_6 = arith.constant 0 : index
    %9 = vector.load %arg1[%c0_5, %c0_6] : memref<4x128xf32, #tpu.memory_space<vmem>>, vector<4x128xf32>
    %c0_7 = arith.constant 0 : index
    %c0_8 = arith.constant 0 : index
    %10 = vector.load %arg5[%c0_7, %c0_8] : memref<160x192xf32, #tpu.memory_space<vmem>>, vector<128x192xf32>
    %cst_9 = arith.constant dense<0.000000e+00> : vector<4x192xf32>
    %11 = tpu.matmul %9, %10, %cst_9 {dimension_numbers = #tpu.dot_dimension_numbers<[1], [0], [0], [1], [0, 0, 1, 1], [], []>} : vector<4x128xf32>, vector<128x192xf32>, vector<4x192xf32> -> vector<4x192xf32>
    %c128 = arith.constant 128 : index
    %c0_10 = arith.constant 0 : index
    %12 = vector.load %arg5[%c128, %c0_10] : memref<160x192xf32, #tpu.memory_space<vmem>>, vector<32x192xf32>
    %cst_11 = arith.constant dense<0.000000e+00> : vector<4x192xf32>
    %13 = tpu.matmul %7, %12, %cst_11 {dimension_numbers = #tpu.dot_dimension_numbers<[1], [0], [0], [1], [0, 0, 1, 1], [], []>} : vector<4x32xf32>, vector<32x192xf32>, vector<4x192xf32> -> vector<4x192xf32>
    %14 = arith.addf %11, %13 : vector<4x192xf32>
    %c0_12 = arith.constant 0 : index
    %c0_13 = arith.constant 0 : index
    %15 = vector.load %arg6[%c0_12, %c0_13] : memref<1x192xf32, #tpu.memory_space<vmem>>, vector<1x192xf32>
    %16 = vector.broadcast %15 : vector<1x192xf32> to vector<4x192xf32>
    %17 = arith.addf %14, %16 : vector<4x192xf32>
    %18 = vector.extract_strided_slice %17 {offsets = [0, 0], sizes = [4, 128], strides = [1, 1]} : vector<4x192xf32> to vector<4x128xf32>
    %19 = math.tanh %18 : vector<4x128xf32>
    %20 = vector.extract_strided_slice %17 {offsets = [0, 128], sizes = [4, 64], strides = [1, 1]} : vector<4x192xf32> to vector<4x64xf32>
    %21 = arith.negf %20 : vector<4x64xf32>
    %22 = math.exp %21 : vector<4x64xf32>
    %cst_14 = arith.constant 1.000000e+00 : f32
    %23 = vector.broadcast %cst_14 : f32 to vector<4x64xf32>
    %24 = arith.addf %23, %22 : vector<4x64xf32>
    %25 = arith.divf %23, %24 : vector<4x64xf32>
    %26 = vector.extract_strided_slice %19 {offsets = [0, 0], sizes = [4, 64], strides = [1, 1]} : vector<4x128xf32> to vector<4x64xf32>
    %27 = vector.extract_strided_slice %19 {offsets = [0, 64], sizes = [4, 64], strides = [1, 1]} : vector<4x128xf32> to vector<4x64xf32>
    %c0_15 = arith.constant 0 : index
    %c0_16 = arith.constant 0 : index
    %28 = vector.load %arg3[%c0_15, %c0_16] : memref<4x64xf32, #tpu.memory_space<vmem>>, vector<4x64xf32>
    %29 = arith.mulf %27, %28 : vector<4x64xf32>
    %30 = arith.addf %26, %29 : vector<4x64xf32>
    %31 = arith.mulf %30, %25 : vector<4x64xf32>
    %c0_17 = arith.constant 0 : index
    %c0_18 = arith.constant 0 : index
    %32 = vector.load %arg7[%c0_17, %c0_18] : memref<4x64xf32, #tpu.memory_space<vmem>>, vector<4x64xf32>
    tpu.vector_store %arg7[%c0_17, %c0_18], %31 {strides = array<i32>} : memref<4x64xf32, #tpu.memory_space<vmem>>, vector<4x64xf32>,
    return
  }
  func.func @transform_0(%arg0: i32) -> (i32, i32) {
    %c0_i32 = arith.constant 0 : i32
    %c0_i32_0 = arith.constant 0 : i32
    return %arg0, %c0_i32 : i32, i32
  }
  func.func @transform_1(%arg0: i32) -> (i32, i32) {
    %c0_i32 = arith.constant 0 : i32
    %c0_i32_0 = arith.constant 0 : i32
    return %arg0, %c0_i32 : i32, i32
  }
  func.func @transform_2(%arg0: i32) -> (i32, i32) {
    %c0_i32 = arith.constant 0 : i32
    %c0_i32_0 = arith.constant 0 : i32
    return %arg0, %c0_i32 : i32, i32
  }
  func.func @transform_3(%arg0: i32) -> (i32, i32) {
    %c0_i32 = arith.constant 0 : i32
    %c0_i32_0 = arith.constant 0 : i32
    %c0_i32_1 = arith.constant 0 : i32
    return %c0_i32, %c0_i32_0 : i32, i32
  }
  func.func @transform_4(%arg0: i32) -> (i32, i32) {
    %c0_i32 = arith.constant 0 : i32
    %c0_i32_0 = arith.constant 0 : i32
    %c0_i32_1 = arith.constant 0 : i32
    return %c0_i32, %c0_i32_0 : i32, i32
  }
  func.func @transform_5(%arg0: i32) -> (i32, i32) {
    %c0_i32 = arith.constant 0 : i32
    %c0_i32_0 = arith.constant 0 : i32
    %c0_i32_1 = arith.constant 0 : i32
    return %c0_i32, %c0_i32_0 : i32, i32
  }
  func.func @transform_6(%arg0: i32) -> (i32, i32) {
    %c0_i32 = arith.constant 0 : i32
    %c0_i32_0 = arith.constant 0 : i32
    return %arg0, %c0_i32 : i32, i32
  }
  func.func @transform_7(%arg0: i32) -> (i32, i32) {
    %c0_i32 = arith.constant 0 : i32
    %c0_i32_0 = arith.constant 0 : i32
    return %arg0, %c0_i32 : i32, i32
  }
}

</mosaic_0001>

<bundles_post_ra>
// kernel: tpu_custom_call.1
= control target key start
LH: loop header
LB: loop body
LE: loop exit
PB: predicated region body
PF: predicated region fallthrough
CT: control target
= control target key end

     0   :  { %13 = vsyncpa [#allocation3], 0  ;;  %s626_s0 = inlined_call_operand.vmem [shape: f32[4,128], index: 0, kind: input, shape index: {}]   ;;  %s627_s1 = inlined_call_operand.vmem [shape: s32[4,1], index: 1, kind: input, shape index: {}]   ;;  %s628_s2 = inlined_call_operand.vmem [shape: f32[4,64], index: 2, kind: input, shape index: {}]   ;;  %s629_s3 = inlined_call_operand.vmem [shape: f32[8,32], index: 3, kind: input, shape index: {}]   ;;  %s630_s4 = inlined_call_operand.hbm [shape: f32[160,192], index: 4, kind: input, shape index: {}]   ;;  %s631_s5 = inlined_call_operand.vmem [shape: f32[1,192], index: 5, kind: input, shape index: {}]   ;;  %s632_s6 = inlined_call_operand.hbm [shape: f32[4,64], index: 6, kind: output, shape index: {0}]   ;;  %s633_s7 = inlined_call_operand.hbm [shape: f32[4,32], index: 7, kind: output, shape index: {1}]  }
   0x1   :  { %14 = vsyncpa [#allocation4], 0 }
   0x2   :  { %15 = vsyncpa [#allocation7], 0  ;;  %s519_s24 = smov [#allocation2]   ;;  %s447_s28 = scalar_lea.hbm %s630_s4, 5120 }
   0x3   :  { %s29_s25 = sshll.u32 %s519_s24, 4  ;;  %p448_p0 = scmp.ne.s32.totalorder %s630_s4, %s447_s28  ;;  %s30_s25 = int_to_ptr.vmem [resolvable:$true] %s29_s25 }
   0x4   :  { %p451_p1 = scmp.lt.u32.totalorder %s447_s28, %s630_s4 }
   0x6   :  { %p453_p2 = pnand %p451_p1, %p448_p0 }
   0x8   :  { %456 = shalt.err (!%p453_p2)
}
   0x9   :  { %s457_s10 = scalar_lea.vmem %s30_s25, 5120  ;;  %p462_p4 = scmp.lt.s32.totalorder %s30_s25, %s30_s25 }
   0xa   :  { %p458_p3 = scmp.ne.s32.totalorder %s30_s25, %s457_s10  ;;  %p463_p5 = scmp.lt.s32.totalorder %s457_s10, %s457_s10 }
   0xc   :  { %p464_p6 = por %p463_p5, %p462_p4 }
   0xe   :  { %p465_p7 = pnand %p464_p6, %p458_p3 }
  0x10   :  { %468 = shalt.err (!%p465_p7)
}
  0x11   :  { %s520_s11 = smov 256   ;;  %s521_s12 = smov 16  }
  0x12   :  { %35 = dma.hbm_to_vmem [thread:$0]  %s630_s4, 5120, %s30_s25, [#allocation3], %s520_s11, %s520_s11, %s521_s12  }
  0x13   :  { %513 = dma.done.wait [#allocation3], 5120  }
  0x14   :  { %514 = vsyncadd [#allocation3], 4294962176  ;;  %v522_v0 = vmov 0   ;;  %v523_v1 = vmov 0.0   ;;  %v41_v2 = vld [vmem:[%s627_s1] sm:$0xf]  ;;  %v42_v55 = vlaneseq }
  0x15   :  { %440 = vset.pattern.permute.xlu0 %v522_v0  ;;  %384 = vmatprep.subr.mxu0 %v523_v1  ;;  %v50_v3 = vld [vmem:[%s629_s3] sm:$0xff]  ;;  %vm524_vm0 = vmmov 0   ;;  %v129_v4 = vld [vmem:[#allocation2 + $0x8] sm:$0xff]  ;;  %v131_v5 = vld [vmem:[#allocation2 + $0x18] sm:$0xff]  ;;  %vm51_vm1 = vcmask 64512   ;;  %s525_s20 = smov 64  }
  0x16   :  { %307 = vmatprep.mubr.f32.mxu1 %v523_v1  ;;  %45 = vperm.xlu0 %440, %v41_v2   ;;  %v128_v6 = vld [vmem:[#allocation2] sm:$0xff]  ;;  %v397_v7 = vpack.c.bf16 %v131_v5, %v129_v4  ;;  %v130_v8 = vld [vmem:[#allocation2 + $0x10] sm:$0xff]  ;;  %v133_v9 = vld [vmem:[#allocation2 + $0x28] sm:$0xff]  ;;  %v43_v56 = vand.u32 127, %v42_v55  ;;  %vm168_vm3 = vcmask 261120   ;;  %vm125_vm4 = vcmask 257024  }
  0x17   :  { %385 = vmatpush3.msra.mxu0 %v50_v3  ;;  %386 = vmatprep.mubr.msk.f32.mxu0 %vm524_vm0, %v523_v1  ;;  %v135_v10 = vld [vmem:[#allocation2 + $0x38] sm:$0xff]  ;;  %v399_v11 = vpack.c.bf16 %v130_v8, %v128_v6  ;;  %v132_v13 = vld [vmem:[#allocation2 + $0x20] sm:$0xff]  ;;  %v134_v14 = vld [vmem:[#allocation2 + $0x30] sm:$0xff] }
  0x18   :  { %v401_v12 = vpack.c.bf16 %v135_v10, %v133_v9  ;;  %v137_v15 = vld [vmem:[#allocation2 + $0x48] sm:$0xff]  ;;  %398 = vmatprep.subr.bf16.mxu1 %v397_v7  ;;  %v139_v16 = vld [vmem:[#allocation2 + $0x58] sm:$0xff]  ;;  %v403_v17 = vpack.c.bf16 %v134_v14, %v132_v13  ;;  %v136_v19 = vld [vmem:[#allocation2 + $0x40] sm:$0xff] }
  0x19   :  { %400 = vmatpush1.bf16.msra.mxu1 %v399_v11  ;;  %v405_v18 = vpack.c.bf16 %v139_v16, %v137_v15  ;;  %v138_v20 = vld [vmem:[#allocation2 + $0x50] sm:$0xff]  ;;  %v141_v21 = vld [vmem:[#allocation2 + $0x68] sm:$0xff]  ;;  %v143_v22 = vld [vmem:[#allocation2 + $0x78] sm:$0xff] }
  0x1a   :  { %402 = vmatprep.subr.bf16.mxu1 %v401_v12  ;;  %v407_v23 = vpack.c.bf16 %v138_v20, %v136_v19  ;;  %v161_v24 = vld [vmem:[#allocation2 + $0x108] sm:$0xff]  ;;  %v409_v25 = vpack.c.bf16 %v143_v22, %v141_v21  ;;  %v140_v26 = vld [vmem:[#allocation2 + $0x60] sm:$0xff]  ;;  %v142_v27 = vld [vmem:[#allocation2 + $0x70] sm:$0xff] }
  0x1b   :  { %v163_v28 = vld [vmem:[#allocation2 + $0x118] sm:$0xff]  ;;  %v145_v29 = vld [vmem:[#allocation2 + $0x88] sm:$0xff]  ;;  %v411_v32 = vpack.c.bf16 %v142_v27, %v140_v26  ;;  %v144_v34 = vld [vmem:[#allocation2 + $0x80] sm:$0xff] }
  0x1c   :  { %v147_v30 = vld [vmem:[#allocation2 + $0x98] sm:$0xff]  ;;  %v389_v31 = vpack.c.bf16 %v163_v28, %v161_v24  ;;  %v146_v35 = vld [vmem:[#allocation2 + $0x90] sm:$0xff]  ;;  %v149_v36 = vld [vmem:[#allocation2 + $0xa8] sm:$0xff] }
  0x1d   :  { %404 = vmatpush1.bf16.msra.mxu1 %v403_v17  ;;  %v413_v33 = vpack.c.bf16 %v147_v30, %v145_v29  ;;  %v151_v37 = vld [vmem:[#allocation2 + $0xb8] sm:$0xff]  ;;  %v415_v38 = vpack.c.bf16 %v146_v35, %v144_v34  ;;  %v148_v40 = vld [vmem:[#allocation2 + $0xa0] sm:$0xff]  ;;  %v150_v41 = vld [vmem:[#allocation2 + $0xb0] sm:$0xff] }
  0x1e   :  { %406 = vmatprep.subr.bf16.mxu1 %v405_v18  ;;  %390 = vmatprep.subr.bf16.mxu0 %v389_v31  ;;  %v417_v39 = vpack.c.bf16 %v151_v37, %v149_v36  ;;  %v153_v42 = vld [vmem:[#allocation2 + $0xc8] sm:$0xff]  ;;  %v155_v43 = vld [vmem:[#allocation2 + $0xd8] sm:$0xff]  ;;  %v419_v44 = vpack.c.bf16 %v150_v41, %v148_v40  ;;  %v152_v46 = vld [vmem:[#allocation2 + $0xc0] sm:$0xff] }
  0x1f   :  { %v421_v45 = vpack.c.bf16 %v155_v43, %v153_v42  ;;  %v154_v47 = vld [vmem:[#allocation2 + $0xd0] sm:$0xff]  ;;  %v157_v48 = vld [vmem:[#allocation2 + $0xe8] sm:$0xff]  ;;  %v159_v49 = vld [vmem:[#allocation2 + $0xf8] sm:$0xff] }
  0x20   :  { %v423_v50 = vpack.c.bf16 %v154_v47, %v152_v46  ;;  %v425_v51 = vpack.c.bf16 %v159_v49, %v157_v48  ;;  %v156_v52 = vld [vmem:[#allocation2 + $0xe0] sm:$0xff]  ;;  %v158_v53 = vld [vmem:[#allocation2 + $0xf0] sm:$0xff]  ;;  %v165_v59 = vld [vmem:[#allocation2 + $0x128] sm:$0xff] }
  0x21   :  { %408 = vmatpush1.bf16.msra.mxu1 %v407_v23  ;;  %v427_v54 = vpack.c.bf16 %v158_v53, %v156_v52  ;;  %v160_v57 = vld [vmem:[#allocation2 + $0x100] sm:$0xff]  ;;  %v162_v58 = vld [vmem:[#allocation2 + $0x110] sm:$0xff]  ;;  %v167_v60 = vld [vmem:[#allocation2 + $0x138] sm:$0xff] }
  0x22   :  { %410 = vmatprep.subr.bf16.mxu1 %v409_v25  ;;  %v391_v62 = vpack.c.bf16 %v162_v58, %v160_v57  ;;  %v393_v63 = vpack.c.bf16 %v167_v60, %v165_v59  ;;  %v164_v0 = vld [vmem:[#allocation2 + $0x120] sm:$0xff]  ;;  %v166_v2 = vld [vmem:[#allocation2 + $0x130] sm:$0xff] }
  0x23   :  { %v395_v4 = vpack.c.bf16 %v166_v2, %v164_v0  ;;  %v127_v5 = vld [vmem:[%s626_s0] sm:$0xf]  ;;  %s526_s0 = smov [#allocation6]  }
  0x24   :  { %v335_v6 = vld [vmem:[%s628_s2] sm:$0xf]  ;;  %s365_s2 = sshll.u32 %s526_s0, 4  ;;  %s366_s2 = int_to_ptr.vmem [resolvable:$true] %s365_s2 }
  0x25   :  { %412 = vmatpush1.bf16.msra.mxu1 %v411_v32  ;;  %337 = vrot.lane.b32.xlu0 %v335_v6, %s525_s20  ;;  %v314_v10 = vld [vmem:[%s631_s5] sm:$0x3]  ;;  %s469_s23 = scalar_lea.vmem %s366_s2, 64  ;;  %p474_p9 = scmp.lt.s32.totalorder %s366_s2, %s366_s2 }
  0x26   :  { %414 = vmatprep.subr.bf16.mxu1 %v413_v33  ;;  %p470_p8 = scmp.ne.s32.totalorder %s366_s2, %s469_s23  ;;  %p475_p10 = scmp.lt.s32.totalorder %s469_s23, %s469_s23 }
  0x28   :  { %p476_p11 = por %p475_p10, %p474_p9 }
  0x29   :  { %416 = vmatpush1.bf16.msra.mxu1 %v415_v38 }
  0x2a   :  { %418 = vmatprep.subr.bf16.mxu1 %v417_v39  ;;  %p477_p12 = pnand %p476_p11, %p470_p8 }
  0x2d   :  { %420 = vmatpush1.bf16.msra.mxu1 %v419_v44 }
  0x2e   :  { %422 = vmatprep.subr.bf16.mxu1 %v421_v45 }
  0x31   :  { %424 = vmatpush1.bf16.msra.mxu1 %v423_v50 }
  0x32   :  { %426 = vmatprep.subr.bf16.mxu1 %v425_v51 }
  0x35   :  { %428 = vmatpush1.bf16.msra.mxu1 %v427_v54 }
  0x38   :  { %308 = vmatmul.mubr.f32.vlgmr.msra.gmra.mrb[0].mxu1 %v127_v5 }
  0x95   :  { %v46_v61 = vpop.permute.xlu0 %45 }
  0x96   :  { %vm47_vm2 = vcmp.eq.s32.totalorder %v46_v61, %v43_v56 }
  0x97   :  { %v378_v3 = vsel %vm47_vm2, 1.0, %v523_v1 }
  0x98   :  { %387 = vmatmul.mubr.msk.f32.vlgmr.msra.gmra.mrb[0].mxu0 %vm51_vm1, %v378_v3 }
  0x99   :  { %392 = vmatpush1.bf16.msra.mxu0 %v391_v62  ;;  %236 = vmatprep.mubr.f32.mxu0 %v523_v1  ;;  %v317_v1 = vshrl.u32 %v42_v55, 7 }
  0x9a   :  { %394 = vmatprep.subr.bf16.mxu0 %v393_v63 }
  0x9b   :  { %v322_v12 = vsub.s32 1, %v317_v1  ;;  %v318_v14 = vsub.s32 0, %v317_v1 }
  0x9d   :  { %396 = vmatpush1.bf16.msra.mxu0 %v395_v4  ;;  %v323_v13 = vrot.slane %v314_v10, %v322_v12  ;;  %v319_v15 = vrot.slane %v314_v10, %v318_v14 }
 0x10b   :  { %v309_v9 = vpop.f32.mrb[0].mxu1 }
 0x10c   :  { %v311_v11 = vpop.f32.mrb[1].mxu1 }
 0x16b   :  { %v121_v7 = vpop.f32.mrb[0].mxu0 }
 0x16c   :  { %v388_v8 = vpop.f32.mrb[1].mxu0  ;;  %380 = vmatmul.mubr.msk.f32.vlgmr.msra.gmra.mrb[2].mxu0 %vm168_vm3, %v121_v7  ;;  %126 = vst.msk [vmem:[#allocation6] sm:$0xf] %vm125_vm4, %v121_v7 }
 0x23f   :  { %v238_v16 = vpop.f32.mrb[2].mxu0 }
 0x240   :  { %v310_v17 = vadd.f32 %v309_v9, %v238_v16  ;;  %v240_v18 = vpop.f32.mrb[3].mxu0 }
 0x241   :  { %v312_v19 = vadd.f32 %v311_v11, %v240_v18 }
 0x242   :  { %v326_v20 = vadd.f32 %v319_v15, %v310_v17 }
 0x243   :  { %v327_v21 = vadd.f32 %v323_v13, %v312_v19 }
 0x244   :  { %441 = vtanh.f32 %v326_v20 }
 0x245   :  { %480 = shalt.err (!%p477_p12)
}
 0x246   :  { %s481_s25 = scalar_lea.hbm %s633_s7, 64 }
 0x247   :  { %p482_p13 = scmp.ne.s32.totalorder %s633_s7, %s481_s25  ;;  %p485_p0 = scmp.lt.u32.totalorder %s481_s25, %s633_s7 }
 0x249   :  { %p487_p1 = pnand %p485_p0, %p482_p13 }
 0x24b   :  { %490 = shalt.err (!%p487_p1)
}
 0x24c   :  { %368 = dma.vmem_to_hbm [thread:$0]  %s366_s2, 64, %s633_s7, [#allocation7]   ;;  %v338_v22 = vpop.permute.xlu0 %337  ;;  %v381_v25 = vmul.f32 -1.442695, %v327_v21  ;;  %vm347_vm5 = vcmask 519168  }
 0x24d   :  { %s527_s9 = smov [#allocation5]  }
 0x24e   :  { %v442_v23 = vpop.eup %441  ;;  %443 = vpow2.f32 %v381_v25  ;;  %s355_s10 = sshll.u32 %s527_s9, 4  ;;  %s356_s10 = int_to_ptr.vmem [resolvable:$true] %s355_s10 }
 0x24f   :  { %v340_v24 = vmul.f32 %v442_v23, %v338_v22  ;;  %s491_s7 = scalar_lea.vmem %s356_s10, 64  ;;  %p496_p3 = scmp.lt.s32.totalorder %s356_s10, %s356_s10 }
 0x250   :  { %p492_p2 = scmp.ne.s32.totalorder %s356_s10, %s491_s7  ;;  %p497_p4 = scmp.lt.s32.totalorder %s491_s7, %s491_s7 }
 0x251   :  { %342 = vrot.lane.b32.xlu1 %v340_v24, %s525_s20 }
 0x252   :  { %p498_p5 = por %p497_p4, %p496_p3 }
 0x254   :  { %p499_p6 = pnand %p498_p5, %p492_p2 }
 0x258   :  { %v444_v26 = vpop.eup %443 }
 0x259   :  { %v332_v27 = vadd.f32 1.0, %v444_v26 }
 0x25b   :  { %445 = vrcp.f32 %v332_v27 }
 0x265   :  { %v446_v30 = vpop.eup %445 }
 0x2c3   :  { %v343_v28 = vpop.permute.xlu1 %342 }
 0x2c4   :  { %v345_v29 = vadd.f32 %v442_v23, %v343_v28 }
 0x2c6   :  { %v346_v31 = vmul.f32 %v446_v30, %v345_v29 }
 0x2c8   :  { %348 = vst.msk [vmem:[#allocation5] sm:$0xf] %vm347_vm5, %v346_v31 }
 0x2c9   :  { %502 = shalt.err (!%p499_p6)
}
 0x2ca   :  { %s503_s13 = scalar_lea.hbm %s632_s6, 64 }
 0x2cb   :  { %p504_p7 = scmp.ne.s32.totalorder %s632_s6, %s503_s13  ;;  %p507_p8 = scmp.lt.u32.totalorder %s503_s13, %s632_s6 }
 0x2cd   :  { %p509_p9 = pnand %p507_p8, %p504_p7 }
 0x2cf   :  { %512 = shalt.err (!%p509_p9)
}
 0x2d0   :  { %358 = dma.vmem_to_hbm [thread:$0]  %s356_s10, 64, %s632_s6, [#allocation4]  }
 0x2d1   :  { %515 = dma.done.wait [#allocation4], 64  }
 0x2d2   :  { %516 = vsyncadd [#allocation4], 4294967232 }
 0x2d3   :  { %517 = dma.done.wait [#allocation7], 64  }
 0x2d4   :  { %518 = vsyncadd [#allocation7], 4294967232 }
 0x2d5   :  { %375 = vsyncpa [#allocation3], 1 }
 0x2d6   :  { %376 = vsyncpa [#allocation4], 1 }
 0x2d7   :  { %377 = vsyncpa [#allocation7], 1 }

</bundles_post_ra>
